<compile_context>
chip_gen: v7x
topology: tpu7x:2x2x1
jax: 0.10.0
libtpu: 0.0.40
codegen_flags: <defaults>
</compile_context>

<pallas_src>
import jax
import jax.numpy as jnp
import numpy as np
from jax.experimental import pallas as pl
from jax.experimental.pallas import tpu as pltpu

NUM_STEPS = 1000          # diffusion schedule length (self.T in the PyTorch module)
LANE = 128                # TPU lane width
MAX_TILE_ROWS = 1024      # 1024 rows * 128 lanes * 4 B = 512 KiB per buffer
                          # (3 arrays * 2 pipeline buffers -> ~3 MiB VMEM, safe on v7x)


def _make_schedule():
    betas = np.linspace(0.0001, 0.02, NUM_STEPS, dtype=np.float32)
    alphas = 1.0 - betas
    alphas_bar = np.cumprod(alphas).astype(np.float32)
    return jnp.asarray(betas), jnp.asarray(alphas), jnp.asarray(alphas_bar)


def _diffusion_kernel(ca_ref, cb_ref, x_ref, noise_ref, out_ref):
    # ca_ref / cb_ref: SMEM f32[B] (scalar-prefetch, precomputed coefficients)
    # x_ref / noise_ref / out_ref: VMEM f32[1, TILE_ROWS, 128] tiles
    b = pl.program_id(0)
    out_ref[...] = x_ref[...] * ca_ref[b] + cb_ref[b] * noise_ref[...]


def diffusion_forward(x, t_idx, alphas_bar, noise):
    """noisy = x * sqrt(alphas_bar[T]) + sqrt(1 - alphas_bar[T]) * noise.

    x, noise: [B, C, D, H, W]; t_idx: int32[B]; alphas_bar: f32[1000].
    Works for arbitrary per-sample sizes (pads to a lane-dense layout).
    """
    orig_shape = x.shape
    orig_dtype = x.dtype
    B = orig_shape[0]
    N = int(np.prod(orig_shape[1:]))

    # Precompute per-sample scalar coefficients in the wrapper (cheap, fuses
    # into surrounding XLA); avoids a per-tile SMEM gather + sqrt in the kernel.
    coef_a = jnp.sqrt(alphas_bar[t_idx]).astype(jnp.float32)
    coef_b = jnp.sqrt(1.0 - alphas_bar[t_idx]).astype(jnp.float32)

    # Choose row tile and padded row count so the last two block dims satisfy
    # the (8, 128) constraint and the per-buffer size stays ~<= 512 KiB.
    rows = -(-N // LANE)                      # ceil(N / 128)
    if rows <= MAX_TILE_ROWS:
        tile_rows = -(-rows // 8) * 8         # round up to a multiple of 8
        s_pad = tile_rows                     # single row-tile per sample
    else:
        tile_rows = MAX_TILE_ROWS
        s_pad = -(-rows // tile_rows) * tile_rows
    n_pad = s_pad * LANE

    xf = x.reshape(B, N).astype(jnp.float32)
    nf = noise.reshape(B, N).astype(jnp.float32)
    if n_pad != N:
        pad = ((0, 0), (0, n_pad - N))
        xf = jnp.pad(xf, pad)
        nf = jnp.pad(nf, pad)
    x2 = xf.reshape(B, s_pad, LANE)
    n2 = nf.reshape(B, s_pad, LANE)

    grid = (B, s_pad // tile_rows)

    out = pl.pallas_call(
        _diffusion_kernel,
        out_shape=jax.ShapeDtypeStruct((B, s_pad, LANE), jnp.float32),
        grid_spec=pltpu.PrefetchScalarGridSpec(
            num_scalar_prefetch=2,
            grid=grid,
            in_specs=[
                pl.BlockSpec((1, tile_rows, LANE), lambda b, s, ca, cb: (b, s, 0)),
                pl.BlockSpec((1, tile_rows, LANE), lambda b, s, ca, cb: (b, s, 0)),
            ],
            out_specs=pl.BlockSpec((1, tile_rows, LANE), lambda b, s, ca, cb: (b, s, 0)),
        ),
        compiler_params=pltpu.CompilerParams(
            # Both axes independent: lets v7x's 2 TensorCores split the stream.
            dimension_semantics=("parallel", "parallel"),
        ),
    )(coef_a, coef_b, x2, n2)

    out = out.reshape(B, n_pad)[:, :N].reshape(orig_shape)
    return out.astype(orig_dtype)


def _check(x, t_idx, alphas_bar, noise):
    noisy = diffusion_forward(x, t_idx, alphas_bar, noise)
    noisy = jax.block_until_ready(noisy)
    coef_a = jnp.sqrt(alphas_bar[t_idx])[:, None, None, None, None]
    coef_b = jnp.sqrt(1.0 - alphas_bar[t_idx])[:, None, None, None, None]
    ref = x * coef_a + coef_b * noise
    np.testing.assert_allclose(np.asarray(noisy), np.asarray(ref),
                               rtol=1e-6, atol=1e-6)


if __name__ == "__main__":
    betas, alphas, alphas_bar = _make_schedule()

    key = jax.random.PRNGKey(0)
    kx, kt, kn, kx2, kn2 = jax.random.split(key, 5)

    # aligned 5-D input: [B, C, D, H, W] — per-sample 4*4*8*8 = 1024 = 8*128
    B, C, D, H, W = 2, 4, 4, 8, 8
    x = jax.random.normal(kx, (B, C, D, H, W), dtype=jnp.float32)
    t_idx = jax.random.randint(kt, (B,), 0, NUM_STEPS, dtype=jnp.int32)
    # torch.randn_like(x) equivalent (deterministic here via PRNGKey)
    noise = jax.random.normal(kn, x.shape, dtype=jnp.float32)
    _check(x, t_idx, alphas_bar, noise)

    # non-aligned shape to exercise the padding path (per-sample 945 elems)
    x_odd = jax.random.normal(kx2, (B, 3, 5, 7, 9), dtype=jnp.float32)
    noise_odd = jax.random.normal(kn2, x_odd.shape, dtype=jnp.float32)
    _check(x_odd, t_idx, alphas_bar, noise_odd)

    print("KERNEL_OK")
</pallas_src>

<mosaic_0001>
module attributes {stable_mosaic.version = 11 : i64} {
  func.func @_diffusion_kernel(%arg0: i32, %arg1: i32, %arg2: memref<2xf32, #tpu.memory_space<smem>>, %arg3: memref<2xf32, #tpu.memory_space<smem>>, %arg4: memref<1x8x128xf32, #tpu.memory_space<vmem>>, %arg5: memref<1x8x128xf32, #tpu.memory_space<vmem>>, %arg6: memref<1x8x128xf32, #tpu.memory_space<vmem>>) attributes {dimension_semantics = [#tpu.dimension_semantics<parallel>, #tpu.dimension_semantics<parallel>], iteration_bounds = array<i64: 2, 1>, scalar_prefetch = 2 : i64, scratch_operands = 0 : i64, tpu.core_type = #tpu.core_type<tc>, window_params = [{transform_indices = @transform_0, window_bounds = array<i64: 1, 8, 128>}, {transform_indices = @transform_1, window_bounds = array<i64: 1, 8, 128>}, {transform_indices = @transform_2, window_bounds = array<i64: 1, 8, 128>}]} {
    %c0 = arith.constant 0 : index
    %c0_0 = arith.constant 0 : index
    %c0_1 = arith.constant 0 : index
    %0 = vector.load %arg4[%c0, %c0_0, %c0_1] : memref<1x8x128xf32, #tpu.memory_space<vmem>>, vector<1x8x128xf32>
    %1 = arith.index_cast %arg0 : i32 to index
    %2 = memref.load %arg2[%1] : memref<2xf32, #tpu.memory_space<smem>>
    %3 = vector.broadcast %2 : f32 to vector<1x8x128xf32>
    %4 = arith.mulf %0, %3 : vector<1x8x128xf32>
    %5 = arith.index_cast %arg0 : i32 to index
    %6 = memref.load %arg3[%5] : memref<2xf32, #tpu.memory_space<smem>>
    %c0_2 = arith.constant 0 : index
    %c0_3 = arith.constant 0 : index
    %c0_4 = arith.constant 0 : index
    %7 = vector.load %arg5[%c0_2, %c0_3, %c0_4] : memref<1x8x128xf32, #tpu.memory_space<vmem>>, vector<1x8x128xf32>
    %8 = vector.broadcast %6 : f32 to vector<1x8x128xf32>
    %9 = arith.mulf %8, %7 : vector<1x8x128xf32>
    %10 = arith.addf %4, %9 : vector<1x8x128xf32>
    %c0_5 = arith.constant 0 : index
    %c0_6 = arith.constant 0 : index
    %c0_7 = arith.constant 0 : index
    %11 = vector.load %arg6[%c0_5, %c0_6, %c0_7] : memref<1x8x128xf32, #tpu.memory_space<vmem>>, vector<1x8x128xf32>
    tpu.vector_store %arg6[%c0_5, %c0_6, %c0_7], %10 {strides = array<i32>} : memref<1x8x128xf32, #tpu.memory_space<vmem>>, vector<1x8x128xf32>,
    return
  }
  func.func @transform_0(%arg0: i32, %arg1: i32, %arg2: memref<2xf32, #tpu.memory_space<smem>>, %arg3: memref<2xf32, #tpu.memory_space<smem>>) -> (i32, i32, i32) {
    %c0_i32 = arith.constant 0 : i32
    %c0_i32_0 = arith.constant 0 : i32
    return %arg0, %arg1, %c0_i32 : i32, i32, i32
  }
  func.func @transform_1(%arg0: i32, %arg1: i32, %arg2: memref<2xf32, #tpu.memory_space<smem>>, %arg3: memref<2xf32, #tpu.memory_space<smem>>) -> (i32, i32, i32) {
    %c0_i32 = arith.constant 0 : i32
    %c0_i32_0 = arith.constant 0 : i32
    return %arg0, %arg1, %c0_i32 : i32, i32, i32
  }
  func.func @transform_2(%arg0: i32, %arg1: i32, %arg2: memref<2xf32, #tpu.memory_space<smem>>, %arg3: memref<2xf32, #tpu.memory_space<smem>>) -> (i32, i32, i32) {
    %c0_i32 = arith.constant 0 : i32
    %c0_i32_0 = arith.constant 0 : i32
    return %arg0, %arg1, %c0_i32 : i32, i32, i32
  }
}

</mosaic_0001>

<bundles_post_ra>
// kernel: tpu_custom_call.1
= control target key start
LH: loop header
LB: loop body
LE: loop exit
PB: predicated region body
PF: predicated region fallthrough
CT: control target
= control target key end

     0   :  { %s879_s0 = inlined_call_operand.hbm [shape: f32[2], index: 0, kind: input, shape index: {}]   ;;  %s880_s2 = inlined_call_operand.hbm [shape: f32[2,8,128], index: 2, kind: input, shape index: {}]   ;;  %s881_s3 = inlined_call_operand.hbm [shape: f32[2,8,128], index: 3, kind: input, shape index: {}]   ;;  %s882_s4 = inlined_call_operand.hbm [shape: f32[2,8,128], index: 4, kind: output, shape index: {}]   ;;  %s883_s1 = inlined_call_operand.vmem [shape: f32[2], index: 1, kind: input, shape index: {}]  }
   0x1   :  { %s440_s17 = scalar_lea.hbm %s879_s0, 16 }
   0x2   :  { %p441_p0 = scmp.ne.s32.totalorder %s879_s0, %s440_s17  ;;  %p444_p1 = scmp.lt.u32.totalorder %s440_s17, %s879_s0 }
   0x4   :  { %p446_p2 = pnand %p444_p1, %p441_p0 }
   0x6   :  { %449 = shalt.err (!%p446_p2)  }
   0x7   :  { %s612_s22 = smov [#allocation3]   ;;  %s11_s27 = sshll.u32 %s883_s1, 4  ;;  %s12_s27 = int_to_ptr.vmem [resolvable:$true] %s11_s27 }
   0x8   :  { %10 = dma.hbm_to_smem %s879_s0, 16, %s612_s22, [#allocation2] }
   0x9   :  { %s450_s28 = scalar_lea.vmem %s12_s27, 16  ;;  %p455_p4 = scmp.lt.s32.totalorder %s12_s27, %s12_s27 }
   0xa   :  { %p451_p3 = scmp.ne.s32.totalorder %s12_s27, %s450_s28  ;;  %p456_p5 = scmp.lt.s32.totalorder %s450_s28, %s450_s28 }
   0xc   :  { %p457_p6 = por %p456_p5, %p455_p4 }
   0xe   :  { %p458_p7 = pnand %p457_p6, %p451_p3 }
  0x10   :  { %461 = shalt.err (!%p458_p7)  }
  0x11   :  { %s613_s29 = smov [#allocation4]  }
  0x12   :  { %14 = dma.vmem_to_smem %s12_s27, 16, %s613_s29, [#allocation2] }
  0x13   :  { %574 = dma.done.wait [#allocation2], 32 }
  0x14   :  { %575 = vsyncadd [#allocation2], 4294967264 }
  0x15   :  { %16 = sfence }
  0x16   :  { %17 = vsyncpa [#allocation6], 0 }
  0x17   :  { %19 = vsyncpa [#allocation6 + $0x1], 0 }
  0x18   :  { %20 = vsyncpa [#allocation9], 0 }
  0x19   :  { %22 = vsyncpa [#allocation9 + $0x1], 0 }
  0x1a   :  { %23 = vsyncpa [#allocation7], 0 }
  0x1b   :  { %25 = vsyncpa [#allocation7 + $0x1], 0  ;;  %s657_s0 = smov 0   ;;  %s659_s1 = smov 0  }
  0x1c   :  { %s661_s30 = smov 0   ;;  %s663_s5 = smov 0  }
  0x1d   :  { %s665_s6 = smov 0   ;;  %s667_s7 = smov 0  }
  0x1e LB: > { %s355_s8 = sadd.s32 4294967295, %s610_s7   ;;  %s356_s9 = sadd.s32 4294967294, %s610_s7   ;;  %s610_s7 = sphi %s667_s7, %s31_s7   ;;  %s606_s6 = sphi %s665_s6, %s903_s6   ;;  %s602_s5 = sphi %s663_s5, %s902_s5   ;;  %s598_s30 = sphi %s661_s30, %s901_s30   ;;  %s594_s1 = sphi %s659_s1, %s900_s1   ;;  %s590_s0 = sphi %s657_s0, %s899_s0  }
  0x1f   : > { %s43_s10 = sadd.s32 1, %s606_s6  ;;  %s52_s11 = sadd.s32 1, %s598_s30 }
  0x20   : > { %p45_p8 = scmp.ge.s32.totalorder %s43_s10, 2  ;;  %p59_p9 = scmp.ne.s32.totalorder %s598_s30, %s594_s1 }
  0x21   : > { %p60_p10 = scmp.eq.s32.totalorder %s610_s7, 0  ;;  %p65_p11 = scmp.ne.s32.totalorder %s594_s1, %s590_s0 }
  0x22   : > { %s905_s10 = smov (%p45_p8, %s43_s10), 0  ;;  %p66_p13 = scmp.eq.s32.totalorder %s355_s8, 0 }
  0x23   : > { %p698_p12 = por %p60_p10, %p59_p9  ;;  %s47_s13 = ssub.s32 %s606_s6, %s905_s10 }
  0x24   : > { %p119_p0 = scmp.eq.s32.totalorder %s355_s8, 1  ;;  %p50_p1 = scmp.eq.s32.totalorder %s47_s13, 0 }
  0x25   : > { %p704_p2 = por %p66_p13, %p65_p11  ;;  %p125_p4 = scmp.eq.s32.totalorder %s356_s9, 1 }
  0x26   : > { %p708_p3 = por %p119_p0, %p59_p9  ;;  %p388_p7 = scmp.lt.s32.totalorder %s610_s7, 2 }
  0x27   : > { %s887_s14 = scalar_select %p704_p2, 1, 0 }
  0x28   : > { %s888_s15 = scalar_select %p708_p3, 1, 0 }
  0x29   : > { %s713_s16 = scalar_select %p50_p1, %s598_s30, %s52_s11  }
  0x2a   : > { %p715_p5 = por %p125_p4, %p65_p11  ;;  %s722_s18 = sand.u32 1, %s598_s30  }
  0x2b   : > { %s359_s19 = sshll.u32 %s722_s18, 3  ;;  %s360_s20 = sshll.u32 %s606_s6, 7 }
  0x2c   : > { %s889_s17 = scalar_select %p715_p5, 1, 0 }
  0x2d   : > { %s731_s23 = scalar_lea.hbm %s880_s2, %s360_s20  ;;  %s149_s24 = scalar_lea.vmem [#allocation5], %s359_s19 }
  0x2e   : > { %s157_s25 = sshll.u32 %s149_s24, 4  ;;  %p739_p8 = pnand %p388_p7, %p698_p12  ;;  %s735_s25 = int_to_ptr.vmem [resolvable:$true] %s157_s25 }
  0x2f   : > { %s146_s27 = scalar_lea.sflag [#allocation6], %s722_s18  ;;  %s462_s28 = scalar_lea.hbm %s731_s23, 128 }
  0x30   : > { %p463_p11 = scmp.ne.s32.totalorder %s731_s23, %s462_s28  ;;  %p464_p13 = pneg %p739_p8 }
  0x31   : > { %s467_s9 = scalar_lea.hbm %s880_s2, 256  ;;  %p468_p12 = scmp.lt.u32.totalorder %s731_s23, %s880_s2 }
  0x32   : > { %p465_p0 = pnand %p464_p13, %p463_p11  ;;  %p469_p4 = scmp.lt.u32.totalorder %s467_s9, %s462_s28 }
  0x33   : > { %p471_p6 = scmp.lt.u32.totalorder %s462_s28, %s731_s23 }
  0x34   : > { %p466_p1 = pneg %p465_p0  ;;  %p470_p7 = por %p469_p4, %p468_p12 }
  0x36   : > { %p472_p9 = por %p471_p6, %p470_p7 }
  0x38   : > { %p473_p10 = pnand %p472_p9, %p466_p1 }
  0x3a   : > { %476 = shalt.err (!%p473_p10)
}
  0x3b   : > { %s477_s13 = scalar_lea.vmem %s735_s25, 128  ;;  %s614_s21 = smov [#allocation5]  }
  0x3c   : > { %p478_p11 = scmp.ne.s32.totalorder %s735_s25, %s477_s13  ;;  %s482_s22 = sshll.u32 %s614_s21, 4  ;;  %s483_s22 = int_to_ptr.vmem [resolvable:$false] %s482_s22 }
  0x3d   : > { %s484_s24 = scalar_lea.vmem %s483_s22, 256  ;;  %p485_p3 = scmp.lt.s32.totalorder %s735_s25, %s483_s22 }
  0x3e   : > { %p480_p0 = pnand %p478_p11, %p464_p13  ;;  %p486_p12 = scmp.lt.s32.totalorder %s484_s24, %s477_s13 }
  0x40   : > { %p481_p5 = pneg %p480_p0  ;;  %p487_p4 = por %p486_p12, %p485_p3 }
  0x42   : > { %p488_p6 = pnand %p487_p4, %p481_p5 }
  0x44   : > { %491 = shalt.err (!%p488_p6)
}
  0x45   : > { %380 = dma.hbm_to_vmem [thread:$0]  (!%p739_p8), %s731_s23, 128, %s735_s25, %s146_s27  }
  0x46   : > { %p891_p9 = scmp.lt.s32.totalorder %s610_s7, 3  ;;  %p892_p10 = scmp.ge.s32.totalorder %s610_s7, 1 }
  0x47   : > { %s784_s9 = scalar_lea.hbm %s881_s3, %s360_s20  ;;  %s168_s11 = scalar_lea.vmem [#allocation8], %s359_s19 }
  0x48   : > { %p775_p1 = pnand %p892_p10, %p891_p9  ;;  %s176_s12 = sshll.u32 %s168_s11, 4  ;;  %s177_s12 = int_to_ptr.vmem [resolvable:$true] %s176_s12 }
  0x49   : > { %s165_s23 = scalar_lea.sflag [#allocation9], %s722_s18  ;;  %s492_s25 = scalar_lea.hbm %s784_s9, 128 }
  0x4a   : > { %s893_s28 = scalar_select %p775_p1, 1, 0 }
  0x4b   : > { %p493_p3 = scmp.ne.s32.totalorder %s784_s9, %s492_s25  ;;  %s497_s20 = scalar_lea.hbm %s881_s3, 256 }
  0x4c   : > { %p498_p11 = scmp.lt.u32.totalorder %s784_s9, %s881_s3  ;;  %p499_p0 = scmp.lt.u32.totalorder %s497_s20, %s492_s25 }
  0x4d   : > { %p495_p5 = pnand %p493_p3, %p464_p13  ;;  %p501_p4 = scmp.lt.u32.totalorder %s492_s25, %s784_s9 }
  0x4e   : > { %p500_p12 = por %p499_p0, %p498_p11 }
  0x4f   : > { %p496_p7 = pneg %p495_p5 }
  0x50   : > { %p502_p6 = por %p501_p4, %p500_p12 }
  0x52   : > { %p503_p9 = pnand %p502_p6, %p496_p7 }
  0x54   : > { %506 = shalt.err (!%p503_p9)
}
  0x55   : > { %s507_s18 = scalar_lea.vmem %s177_s12, 128  ;;  %s615_s19 = smov [#allocation8]  }
  0x56   : > { %p508_p10 = scmp.ne.s32.totalorder %s177_s12, %s507_s18  ;;  %s512_s24 = sshll.u32 %s615_s19, 4  ;;  %s513_s24 = int_to_ptr.vmem [resolvable:$false] %s512_s24 }
  0x57   : > { %s514_s29 = scalar_lea.vmem %s513_s24, 256  ;;  %p515_p2 = scmp.lt.s32.totalorder %s177_s12, %s513_s24 }
  0x58   : > { %p510_p3 = pnand %p508_p10, %p464_p13  ;;  %p516_p1 = scmp.lt.s32.totalorder %s514_s29, %s507_s18 }
  0x5a   : > { %p511_p5 = pneg %p510_p3  ;;  %p517_p0 = por %p516_p1, %p515_p2 }
  0x5c   : > { %p518_p11 = pnand %p517_p0, %p511_p5 }
  0x5e   : > { %521 = shalt.err (!%p518_p11)
}
  0x5f   : > { %383 = dma.hbm_to_vmem [thread:$0]  (!%p739_p8), %s784_s9, 128, %s177_s12, %s165_s23  }
  0x60   : > { %p894_p7 = scmp.ne.s32.totalorder %s893_s28, 0 }
  0x61   : > { %s811_s8 = sand.u32 (!%p894_p7), 1, %s594_s1   ;;  %p895_p13 = scmp.ne.s32.totalorder (!%p894_p7), %s887_s14, 0 }
  0x62   : > { %185 = sbr.rel (%p894_p7) target bundleno = 135 (0x87), region = 28  ;;  %s364_s11 = sshll.u32 (!%p894_p7), %s811_s8, 3 }
  0x63   : > { %s188_s25 = scalar_lea.sflag (!%p894_p7), [#allocation6], %s811_s8  ;;  %s191_s27 = scalar_lea.vmem (!%p894_p7), [#allocation5], %s364_s11 }
  0x69   : > { %577 = dma.done.wait (%p895_p13), %s188_s25, 128  }
  0x6a   : > { %579 = vsyncadd (%p895_p13), %s188_s25, 4294967168  ;;  %s197_s26 = scalar_lea.sflag [#allocation9], %s811_s8  ;;  %s200_s9 = scalar_lea.vmem [#allocation8], %s364_s11 }
  0x6b   : > { %581 = dma.done.wait (%p895_p13), %s197_s26, 128  }
  0x6c   : > { %583 = vsyncadd (%p895_p13), %s197_s26, 4294967168  ;;  %s227_s28 = sld [smem:[#allocation3 + %s602_s5]]  ;;  %v226_v0 = vld [vmem:[%s191_s27] sm:$0xff]  ;;  %v231_v2 = vld [vmem:[%s200_s9] sm:$0xff]  ;;  %s225_s23 = scalar_lea.vmem [#allocation10], %s364_s11 }
  0x6d   : > { %s230_s12 = sld [smem:[#allocation4 + %s602_s5]]  ;;  %s251_s13 = sshll.u32 %s225_s23, 4  ;;  %s827_s13 = int_to_ptr.vmem [resolvable:$true] %s251_s13 }
  0x6e   : > { %s368_s20 = sshll.u32 %s602_s5, 7  ;;  %s237_s18 = scalar_lea.sflag [#allocation7], %s811_s8 }
  0x6f   : > { %s832_s22 = scalar_lea.hbm %s882_s4, %s368_s20  ;;  %s522_s19 = scalar_lea.vmem %s827_s13, 128 }
  0x70   : > { %p523_p2 = scmp.ne.s32.totalorder %s827_s13, %s522_s19  ;;  %p896_p8 = scmp.ne.s32.totalorder %s888_s15, 0 }
  0x71   : > { %s616_s5 = smov [#allocation10]  }
  0x72   : > { %v228_v1 = vstv %s227_s28  ;;  %p524_p1 = pnand %p523_p2, %p896_p8  ;;  %s526_s24 = sshll.u32 %s616_s5, 4  ;;  %s527_s24 = int_to_ptr.vmem [resolvable:$false] %s526_s24 }
  0x73   : > { %v232_v3 = vstv %s230_s12  ;;  %v229_v4 = vmul.f32 %v228_v1, %v226_v0  ;;  %s528_s29 = scalar_lea.vmem %s527_s24, 256  ;;  %p529_p4 = scmp.lt.s32.totalorder %s827_s13, %s527_s24 }
  0x74   : > { %v233_v5 = vmul.f32 %v232_v3, %v231_v2  ;;  %p525_p12 = pneg %p524_p1  ;;  %p530_p6 = scmp.lt.s32.totalorder %s528_s29, %s522_s19 }
  0x76   : > { %v234_v6 = vadd.f32 %v233_v5, %v229_v4  ;;  %p531_p9 = por %p530_p6, %p529_p4 }
  0x78   : > { %235 = vst [vmem:[%s225_s23] sm:$0xff] %v234_v6  ;;  %p532_p10 = pnand %p531_p9, %p525_p12 }
  0x7a   : > { %535 = shalt.err (!%p532_p10)
}
  0x7b   : > { %s536_s8 = scalar_lea.hbm %s832_s22, 128  ;;  %s540_s27 = scalar_lea.hbm %s882_s4, 256 }
  0x7c   : > { %p537_p3 = scmp.ne.s32.totalorder %s832_s22, %s536_s8  ;;  %p541_p11 = scmp.lt.u32.totalorder %s832_s22, %s882_s4 }
  0x7d   : > { %p542_p7 = scmp.lt.u32.totalorder %s540_s27, %s536_s8  ;;  %p544_p2 = scmp.lt.u32.totalorder %s536_s8, %s832_s22 }
  0x7e   : > { %p538_p5 = pnand %p537_p3, %p896_p8 }
  0x7f   : > { %p543_p13 = por %p542_p7, %p541_p11 }
  0x80   : > { %p539_p0 = pneg %p538_p5 }
  0x81   : > { %p545_p1 = por %p544_p2, %p543_p13 }
  0x83   : > { %p546_p12 = pnand %p545_p1, %p539_p0 }
  0x85   : > { %549 = shalt.err (!%p546_p12)
}
  0x86   : > { %375 = dma.vmem_to_hbm [thread:$0]  (%p896_p8), %s827_s13, 128, %s832_s22, %s237_s18  }
  0x87 PF: > { %s263_s28 = sand.u32 1, %s590_s0   ;;  %p897_p4 = scmp.ne.s32.totalorder %s889_s17, 0 }
  0x88   : > { %p898_p6 = scmp.ge.s32.totalorder %s610_s7, 2  ;;  %s264_s12 = scalar_lea.sflag [#allocation7], %s263_s28 }
  0x8a   : > { %p385_p9 = pnand %p898_p6, %p897_p4 }
  0x8c   : > { %585 = dma.done.wait (!%p385_p9), %s264_s12, 128  }
  0x8d   : > { %587 = vsyncadd (!%p385_p9), %s264_s12, 4294967168  ;;  %s31_s7 = sadd.s32 1, %s610_s7   ;;  %s899_s0 = smov %s594_s1 }
  0x8e   : > { %p28_p10 = scmp.ge.s32.totalorder %s31_s7, 4   ;;  %s900_s1 = smov %s598_s30 }
  0x8f   : > { %s901_s30 = smov %s713_s16  ;;  %s902_s5 = smov %s606_s6 }
  0x90   : > { %s903_s6 = smov %s905_s10  ;;  %30 = sbr.rel (!%p28_p10) target bundleno = 30 (0x1e), region = 86 }
  0x97   :  { %269 = vsyncpa [#allocation6], 1 }
  0x98   :  { %271 = vsyncpa [#allocation6 + $0x1], 1 }
  0x99   :  { %272 = vsyncpa [#allocation9], 1 }
  0x9a   :  { %274 = vsyncpa [#allocation9 + $0x1], 1 }
  0x9b   :  { %275 = vsyncpa [#allocation7], 1 }
  0x9c   :  { %277 = vsyncpa [#allocation7 + $0x1], 1 }

</bundles_post_ra>
